<compile_context>
chip_gen: v5e
topology: v5e:2x2
jax: 0.10.0
libtpu: 0.0.40
codegen_flags: <defaults>
</compile_context>

<pallas_src>
import functools

import jax
import jax.numpy as jnp
from jax.experimental import pallas as pl
from jax.experimental.pallas import tpu as pltpu

LANE = 128       # vreg lane width -> feature dims padded to multiples of this
SUBLANE = 8      # f32 sublane width -> batch tile multiple of this
NEG_INF = -1e30  # masks padded logit lanes before the softmax (kept in f32!)


def _pad_up(n, m):
    return ((n + m - 1) // m) * m


def _fused_mlp_kernel(*refs, num_layers, compute_dtype):
    """refs = (x_ref, w0, b0, w1, b1, ..., w_{L-1}, b_{L-1}, o_ref).

    Feature dims are pre-padded to multiples of 128, so every matmul / store is
    unmasked.  Hidden activations stay on-core (values) between unrolled layers.
    """
    x_ref = refs[0]
    o_ref = refs[-1]
    wb = refs[1:-1]

    h = x_ref[...]                                    # (TB, Din_pad) bf16, already cast
    for l in range(num_layers):
        w = wb[2 * l][...]                            # (Kpad, Npad) compute_dtype
        b = wb[2 * l + 1][...]                        # (1, Npad) f32 (holds -1e30 mask)
        y = jnp.dot(h, w, preferred_element_type=jnp.float32) + b
        if l < num_layers - 1:
            # hidden layer: ReLU in f32, recast only for the next MXU pass
            h = jnp.maximum(y, 0.0).astype(compute_dtype)
        else:
            # output layer: row softmax.  Padded lanes carry -1e30 logits, so
            # exp() == 0 and they do not leak into the denominator.
            m = jnp.max(y, axis=1, keepdims=True)
            e = jnp.exp(y - m)
            denom = jnp.sum(e, axis=1, keepdims=True)
            # exact divide -> rows sum to 1 to f32 precision (approx recip does not)
            o_ref[...] = (e / denom).astype(o_ref.dtype)


def _prepare_padded_params(params, input_size, compute_dtype):
    """Zero-pad every W/b to lane-dense (128-multiple) shapes.

    Hidden-layer pads are zero (ReLU(0)=0, and zero K-rows of the next W ignore
    them).  The final layer's padded bias lanes are -1e30 (f32) so the softmax
    masks them out.
    """
    padded = []
    prev_p = _pad_up(input_size, LANE)
    num_layers = len(params)
    for idx, (w, b) in enumerate(params):
        fin, fout = w.shape
        fout_p = _pad_up(fout, LANE)
        wp = jnp.zeros((prev_p, fout_p), jnp.float32).at[:fin, :fout].set(w)
        if idx == num_layers - 1:
            bp = jnp.full((1, fout_p), NEG_INF, jnp.float32).at[0, :fout].set(b)
        else:
            bp = jnp.zeros((1, fout_p), jnp.float32).at[0, :fout].set(b)
        padded.append((wp.astype(compute_dtype), bp))   # bias stays f32 on purpose
        prev_p = fout_p
    return padded, _pad_up(input_size, LANE), prev_p


def make_mlp_forward(params, input_size, *, batch_tile=512, compute_dtype=jnp.bfloat16):
    """Prepares padded params ONCE and returns a jitted forward(x) matching
    MLP.forward: hidden Linear+ReLU layers, output Linear, Softmax(dim=1)."""
    padded, din_p, dout_p = _prepare_padded_params(params, input_size, compute_dtype)
    num_layers = len(params)
    dout = params[-1][0].shape[1]

    kernel = functools.partial(
        _fused_mlp_kernel, num_layers=num_layers, compute_dtype=compute_dtype
    )

    # Resident-weight VMEM bytes (default double buffering; 1-row biases pad to
    # 8 sublanes in VMEM).
    weight_bytes = 0
    for wp, bp in padded:
        weight_bytes += wp.shape[0] * wp.shape[1] * wp.dtype.itemsize
        weight_bytes += SUBLANE * bp.shape[1] * 4
    max_width = max([din_p, dout_p] + [wp.shape[1] for wp, _ in padded])
    x_itemsize = jnp.dtype(compute_dtype).itemsize

    @jax.jit
    def forward(x):
        B, Din = x.shape
        assert Din == input_size

        # Batch tiling: multiple of 8 rows, weights resident (block (0,0) every
        # step).  Prefer >= 2 grid steps so both TensorCores get work on v7x.
        tb = min(_pad_up(B, SUBLANE), _pad_up(batch_tile, SUBLANE))
        if _pad_up(B, tb) // tb < 2:
            tb2 = _pad_up(-(-B // 2), SUBLANE)
            if tb2 < tb:
                tb = tb2
        b_p = _pad_up(B, tb)

        # Pad + cast x to bf16 on the host/XLA side: the kernel streams bf16.
        xp = jnp.zeros((b_p, din_p), compute_dtype).at[:B, :Din].set(
            x.astype(compute_dtype))

        in_specs = [pl.BlockSpec((tb, din_p), lambda i: (i, 0))]
        flat_inputs = [xp]
        for wp, bp in padded:
            in_specs.append(pl.BlockSpec(wp.shape, lambda i: (0, 0)))
            in_specs.append(pl.BlockSpec(bp.shape, lambda i: (0, 0)))
            flat_inputs += [wp, bp]

        # Explicit scoped-VMEM budget: resident weights (x2 buffers) + double
        # buffered x/out tiles + activation headroom, clamped to [32, 64] MiB
        # so it is legal on v5e (16 MiB default) through v7x (64 MiB physical).
        needed = (2 * weight_bytes
                  + 2 * tb * din_p * x_itemsize
                  + 2 * tb * dout_p * 4
                  + 4 * tb * max_width * 4)
        vmem_limit = int(min(max(needed + (4 << 20), 32 << 20), 64 << 20))

        out_p = pl.pallas_call(
            kernel,
            out_shape=jax.ShapeDtypeStruct((b_p, dout_p), jnp.float32),
            grid=(b_p // tb,),
            in_specs=in_specs,
            out_specs=pl.BlockSpec((tb, dout_p), lambda i: (i, 0)),
            compiler_params=pltpu.CompilerParams(
                dimension_semantics=("parallel",),
                vmem_limit_bytes=vmem_limit,
            ),
        )(*flat_inputs)

        # Padded lanes / rows are exact zeros / dead rows; slice to true shape.
        return out_p[:B, :dout]

    return forward


def init_mlp_params(key, input_size, hidden_sizes, num_classes):
    """Deterministic init mirroring nn.Linear default (uniform +-1/sqrt(fan_in))."""
    sizes = [input_size] + list(hidden_sizes) + [num_classes]
    params = []
    for i in range(len(sizes) - 1):
        fan_in, fan_out = sizes[i], sizes[i + 1]
        key, kw, kb = jax.random.split(key, 3)
        bound = 1.0 / jnp.sqrt(float(fan_in))
        w = jax.random.uniform(
            kw, (fan_in, fan_out), jnp.float32, minval=-bound, maxval=bound
        )
        b = jax.random.uniform(
            kb, (fan_out,), jnp.float32, minval=-bound, maxval=bound
        )
        params.append((w, b))
    return params


def mlp_reference(params, x):
    """Plain-JAX f32 reference of MLP.forward for correctness checking."""
    h = x
    for (w, b) in params[:-1]:
        h = jnp.maximum(h @ w + b, 0.0)
    w, b = params[-1]
    return jax.nn.softmax(h @ w + b, axis=1)


if __name__ == "__main__":
    key = jax.random.PRNGKey(0)
    batch = 8
    input_size = 32
    hidden_sizes = [64, 48]
    num_classes = 10

    key, kx = jax.random.split(key)
    x = jax.random.normal(kx, (batch, input_size), jnp.float32)
    params = init_mlp_params(key, input_size, hidden_sizes, num_classes)

    mlp_forward = make_mlp_forward(params, input_size)
    out = jax.block_until_ready(mlp_forward(x))

    assert out.shape == (batch, num_classes)
    assert bool(jnp.all(jnp.isfinite(out)))
    # exact divide -> softmax rows sum to 1 up to f32 rounding
    assert jnp.allclose(jnp.sum(out, axis=1), 1.0, atol=1e-3)
    # bf16 matmul operands, f32 accumulation -> loose tolerance vs f32 reference
    ref = mlp_reference(params, x)
    assert jnp.allclose(out, ref, atol=2e-2), float(jnp.max(jnp.abs(out - ref)))

    print("KERNEL_OK")
</pallas_src>

<mosaic_0001>
module attributes {stable_mosaic.version = 11 : i64} {
  func.func @_fused_mlp_kernel(%arg0: i32, %arg1: memref<8x128xbf16, #tpu.memory_space<vmem>>, %arg2: memref<128x128xbf16, #tpu.memory_space<vmem>>, %arg3: memref<1x128xf32, #tpu.memory_space<vmem>>, %arg4: memref<128x128xbf16, #tpu.memory_space<vmem>>, %arg5: memref<1x128xf32, #tpu.memory_space<vmem>>, %arg6: memref<128x128xbf16, #tpu.memory_space<vmem>>, %arg7: memref<1x128xf32, #tpu.memory_space<vmem>>, %arg8: memref<8x128xf32, #tpu.memory_space<vmem>>) attributes {dimension_semantics = [#tpu.dimension_semantics<parallel>], iteration_bounds = array<i64: 1>, scalar_prefetch = 0 : i64, scratch_operands = 0 : i64, tpu.core_type = #tpu.core_type<tc>, window_params = [{transform_indices = @transform_0, window_bounds = array<i64: 8, 128>}, {pipeline_mode = #tpu.pipeline_mode<synchronous>, transform_indices = @transform_1, window_bounds = array<i64: 128, 128>}, {pipeline_mode = #tpu.pipeline_mode<synchronous>, transform_indices = @transform_2, window_bounds = array<i64: 1, 128>}, {pipeline_mode = #tpu.pipeline_mode<synchronous>, transform_indices = @transform_3, window_bounds = array<i64: 128, 128>}, {pipeline_mode = #tpu.pipeline_mode<synchronous>, transform_indices = @transform_4, window_bounds = array<i64: 1, 128>}, {pipeline_mode = #tpu.pipeline_mode<synchronous>, transform_indices = @transform_5, window_bounds = array<i64: 128, 128>}, {pipeline_mode = #tpu.pipeline_mode<synchronous>, transform_indices = @transform_6, window_bounds = array<i64: 1, 128>}, {transform_indices = @transform_7, window_bounds = array<i64: 8, 128>}]} {
    %c0 = arith.constant 0 : index
    %c0_0 = arith.constant 0 : index
    %0 = vector.load %arg1[%c0, %c0_0] : memref<8x128xbf16, #tpu.memory_space<vmem>>, vector<8x128xbf16>
    %c0_1 = arith.constant 0 : index
    %c0_2 = arith.constant 0 : index
    %1 = vector.load %arg2[%c0_1, %c0_2] : memref<128x128xbf16, #tpu.memory_space<vmem>>, vector<128x128xbf16>
    %c0_3 = arith.constant 0 : index
    %c0_4 = arith.constant 0 : index
    %2 = vector.load %arg3[%c0_3, %c0_4] : memref<1x128xf32, #tpu.memory_space<vmem>>, vector<1x128xf32>
    %cst = arith.constant dense<0.000000e+00> : vector<8x128xf32>
    %3 = tpu.matmul %0, %1, %cst {dimension_numbers = #tpu.dot_dimension_numbers<[1], [0], [0], [1], [0, 0, 1, 1], [], []>} : vector<8x128xbf16>, vector<128x128xbf16>, vector<8x128xf32> -> vector<8x128xf32>
    %4 = vector.broadcast %2 : vector<1x128xf32> to vector<8x128xf32>
    %5 = arith.addf %3, %4 : vector<8x128xf32>
    %cst_5 = arith.constant 0.000000e+00 : f32
    %6 = vector.broadcast %cst_5 : f32 to vector<8x128xf32>
    %7 = arith.maximumf %5, %6 : vector<8x128xf32>
    %8 = arith.truncf %7 : vector<8x128xf32> to vector<8x128xbf16>
    %c0_6 = arith.constant 0 : index
    %c0_7 = arith.constant 0 : index
    %9 = vector.load %arg4[%c0_6, %c0_7] : memref<128x128xbf16, #tpu.memory_space<vmem>>, vector<128x128xbf16>
    %c0_8 = arith.constant 0 : index
    %c0_9 = arith.constant 0 : index
    %10 = vector.load %arg5[%c0_8, %c0_9] : memref<1x128xf32, #tpu.memory_space<vmem>>, vector<1x128xf32>
    %cst_10 = arith.constant dense<0.000000e+00> : vector<8x128xf32>
    %11 = tpu.matmul %8, %9, %cst_10 {dimension_numbers = #tpu.dot_dimension_numbers<[1], [0], [0], [1], [0, 0, 1, 1], [], []>} : vector<8x128xbf16>, vector<128x128xbf16>, vector<8x128xf32> -> vector<8x128xf32>
    %12 = vector.broadcast %10 : vector<1x128xf32> to vector<8x128xf32>
    %13 = arith.addf %11, %12 : vector<8x128xf32>
    %cst_11 = arith.constant 0.000000e+00 : f32
    %14 = vector.broadcast %cst_11 : f32 to vector<8x128xf32>
    %15 = arith.maximumf %13, %14 : vector<8x128xf32>
    %16 = arith.truncf %15 : vector<8x128xf32> to vector<8x128xbf16>
    %c0_12 = arith.constant 0 : index
    %c0_13 = arith.constant 0 : index
    %17 = vector.load %arg6[%c0_12, %c0_13] : memref<128x128xbf16, #tpu.memory_space<vmem>>, vector<128x128xbf16>
    %c0_14 = arith.constant 0 : index
    %c0_15 = arith.constant 0 : index
    %18 = vector.load %arg7[%c0_14, %c0_15] : memref<1x128xf32, #tpu.memory_space<vmem>>, vector<1x128xf32>
    %cst_16 = arith.constant dense<0.000000e+00> : vector<8x128xf32>
    %19 = tpu.matmul %16, %17, %cst_16 {dimension_numbers = #tpu.dot_dimension_numbers<[1], [0], [0], [1], [0, 0, 1, 1], [], []>} : vector<8x128xbf16>, vector<128x128xbf16>, vector<8x128xf32> -> vector<8x128xf32>
    %20 = vector.broadcast %18 : vector<1x128xf32> to vector<8x128xf32>
    %21 = arith.addf %19, %20 : vector<8x128xf32>
    %cst_17 = arith.constant dense<0xFF800000> : vector<8xf32>
    %22 = vector.multi_reduction <maximumf>, %21, %cst_17 [1] : vector<8x128xf32> to vector<8xf32>
    %23 = vector.shape_cast %22 : vector<8xf32> to vector<8x1xf32>
    %24 = vector.broadcast %23 : vector<8x1xf32> to vector<8x128xf32>
    %25 = arith.subf %21, %24 : vector<8x128xf32>
    %26 = math.exp %25 : vector<8x128xf32>
    %cst_18 = arith.constant dense<0.000000e+00> : vector<8xf32>
    %27 = vector.multi_reduction <add>, %26, %cst_18 [1] : vector<8x128xf32> to vector<8xf32>
    %28 = vector.shape_cast %27 : vector<8xf32> to vector<8x1xf32>
    %29 = vector.broadcast %28 : vector<8x1xf32> to vector<8x128xf32>
    %30 = arith.divf %26, %29 : vector<8x128xf32>
    %c0_19 = arith.constant 0 : index
    %c0_20 = arith.constant 0 : index
    %31 = vector.load %arg8[%c0_19, %c0_20] : memref<8x128xf32, #tpu.memory_space<vmem>>, vector<8x128xf32>
    tpu.vector_store %arg8[%c0_19, %c0_20], %30 {strides = array<i32>} : memref<8x128xf32, #tpu.memory_space<vmem>>, vector<8x128xf32>,
    return
  }
  func.func @transform_0(%arg0: i32) -> (i32, i32) {
    %c0_i32 = arith.constant 0 : i32
    %c0_i32_0 = arith.constant 0 : i32
    return %arg0, %c0_i32 : i32, i32
  }
  func.func @transform_1(%arg0: i32) -> (i32, i32) {
    %c0_i32 = arith.constant 0 : i32
    %c0_i32_0 = arith.constant 0 : i32
    %c0_i32_1 = arith.constant 0 : i32
    return %c0_i32, %c0_i32_0 : i32, i32
  }
  func.func @transform_2(%arg0: i32) -> (i32, i32) {
    %c0_i32 = arith.constant 0 : i32
    %c0_i32_0 = arith.constant 0 : i32
    %c0_i32_1 = arith.constant 0 : i32
    return %c0_i32, %c0_i32_0 : i32, i32
  }
  func.func @transform_3(%arg0: i32) -> (i32, i32) {
    %c0_i32 = arith.constant 0 : i32
    %c0_i32_0 = arith.constant 0 : i32
    %c0_i32_1 = arith.constant 0 : i32
    return %c0_i32, %c0_i32_0 : i32, i32
  }
  func.func @transform_4(%arg0: i32) -> (i32, i32) {
    %c0_i32 = arith.constant 0 : i32
    %c0_i32_0 = arith.constant 0 : i32
    %c0_i32_1 = arith.constant 0 : i32
    return %c0_i32, %c0_i32_0 : i32, i32
  }
  func.func @transform_5(%arg0: i32) -> (i32, i32) {
    %c0_i32 = arith.constant 0 : i32
    %c0_i32_0 = arith.constant 0 : i32
    %c0_i32_1 = arith.constant 0 : i32
    return %c0_i32, %c0_i32_0 : i32, i32
  }
  func.func @transform_6(%arg0: i32) -> (i32, i32) {
    %c0_i32 = arith.constant 0 : i32
    %c0_i32_0 = arith.constant 0 : i32
    %c0_i32_1 = arith.constant 0 : i32
    return %c0_i32, %c0_i32_0 : i32, i32
  }
  func.func @transform_7(%arg0: i32) -> (i32, i32) {
    %c0_i32 = arith.constant 0 : i32
    %c0_i32_0 = arith.constant 0 : i32
    return %arg0, %c0_i32 : i32, i32
  }
}

</mosaic_0001>

<bundles_post_ra>
// kernel: forward.1
= control target key start
LH: loop header
LB: loop body
LE: loop exit
PB: predicated region body
PF: predicated region fallthrough
CT: control target
= control target key end

     0   :  { %12 = vsyncpa [#allocation3], 0  ;;  %s668_s0 = inlined_call_operand.vmem [shape: bf16[8,128], index: 0, kind: input, shape index: {}]   ;;  %s669_s1 = inlined_call_operand.hbm [shape: bf16[128,128], index: 1, kind: input, shape index: {}]   ;;  %s670_s2 = inlined_call_operand.vmem [shape: f32[1,128], index: 2, kind: input, shape index: {}]   ;;  %s671_s3 = inlined_call_operand.hbm [shape: bf16[128,128], index: 3, kind: input, shape index: {}]   ;;  %s672_s4 = inlined_call_operand.vmem [shape: f32[1,128], index: 4, kind: input, shape index: {}]   ;;  %s673_s5 = inlined_call_operand.hbm [shape: bf16[128,128], index: 5, kind: input, shape index: {}]   ;;  %s674_s6 = inlined_call_operand.vmem [shape: f32[1,128], index: 6, kind: input, shape index: {}]   ;;  %s675_s7 = inlined_call_operand.hbm [shape: f32[8,128], index: 7, kind: output, shape index: {}]  }
   0x1   :  { %13 = vsyncpa [#allocation6], 0 }
   0x2   :  { %14 = vsyncpa [#allocation4], 0  ;;  %s36_s26 = sshll.u32 %s671_s3, 4  ;;  %s598_s27 = smov [#allocation5]   ;;  %s37_s26 = int_to_ptr.hbm [resolvable:$true] %s36_s26 }
   0x3   :  { %s38_s28 = sshll.u32 %s598_s27, 4  ;;  %s21_s8 = sshll.u32 %s669_s1, 4  ;;  %s39_s28 = int_to_ptr.vmem [resolvable:$true] %s38_s28  ;;  %s22_s8 = int_to_ptr.hbm [resolvable:$true] %s21_s8 }
   0x4   :  { %s599_s9 = smov 64   ;;  %s600_s10 = smov 4  }
   0x5   :  { %44 = dma.hbm_to_vmem [thread:$0]  %s37_s26, 1024, %s39_s28, [#allocation6], %s599_s9, %s599_s9, %s600_s10  }
   0x6   :  { %s601_s11 = smov [#allocation2]   ;;  %s51_s15 = sshll.u32 %s673_s5, 4  ;;  %s52_s15 = int_to_ptr.hbm [resolvable:$true] %s51_s15 }
   0x7   :  { %s23_s12 = sshll.u32 %s601_s11, 4  ;;  %s602_s3 = smov [#allocation7]   ;;  %s24_s12 = int_to_ptr.vmem [resolvable:$true] %s23_s12 }
   0x8   :  { %29 = dma.hbm_to_vmem [thread:$0]  %s22_s8, 1024, %s24_s12, [#allocation3], %s599_s9, %s599_s9, %s600_s10  }
   0x9   :  { %s53_s16 = sshll.u32 %s602_s3, 4  ;;  %s54_s16 = int_to_ptr.vmem [resolvable:$true] %s53_s16 }
   0xa   :  { %59 = dma.hbm_to_vmem [thread:$0]  %s52_s15, 1024, %s54_s16, [#allocation6], %s599_s9, %s599_s9, %s600_s10  }
   0xb   :  { %592 = dma.done.wait [#allocation3], 1024  }
   0xc   :  { %593 = vsyncadd [#allocation3], 4294966272 }
   0xd   :  { %594 = dma.done.wait [#allocation6], 2048  }
   0xe   :  { %595 = vsyncadd [#allocation6], 4294965248  ;;  %v466_v0 = vld [vmem:[#allocation2 + $0x38] sm:$0xff]  ;;  %v465_v1 = vld [vmem:[#allocation2 + $0x30] sm:$0xff]  ;;  %s352_s23 = sshll.u32 %s675_s7, 4  ;;  %s353_s23 = int_to_ptr.hbm [resolvable:$true] %s352_s23 }
   0xf   :  { %143 = vmatpush.bf16.msra.mxu0 %v466_v0  ;;  %v474_v2 = vld [vmem:[#allocation5 + $0x38] sm:$0xff]  ;;  %v473_v3 = vld [vmem:[#allocation5 + $0x30] sm:$0xff]  ;;  %v464_v4 = vld [vmem:[#allocation2 + $0x28] sm:$0xff] }
  0x10   :  { %226 = vmatpush.bf16.msra.mxu1 %v474_v2  ;;  %v472_v5 = vld [vmem:[#allocation5 + $0x28] sm:$0xff]  ;;  %v463_v6 = vld [vmem:[#allocation2 + $0x20] sm:$0xff]  ;;  %v462_v8 = vld [vmem:[#allocation2 + $0x18] sm:$0xff] }
  0x11   :  { %v471_v7 = vld [vmem:[#allocation5 + $0x20] sm:$0xff]  ;;  %v470_v9 = vld [vmem:[#allocation5 + $0x18] sm:$0xff]  ;;  %v461_v10 = vld [vmem:[#allocation2 + $0x10] sm:$0xff] }
  0x12   :  { %v469_v11 = vld [vmem:[#allocation5 + $0x10] sm:$0xff]  ;;  %v460_v12 = vld [vmem:[#allocation2 + $0x8] sm:$0xff]  ;;  %v459_v13 = vld [vmem:[#allocation2] sm:$0xff] }
  0x13   :  { %144 = vmatpush.bf16.msra.mxu0 %v465_v1  ;;  %v74_v14 = vld [vmem:[%s668_s0] sm:$0xf]  ;;  %v468_v15 = vld [vmem:[#allocation5 + $0x8] sm:$0xff]  ;;  %v482_v17 = vld [vmem:[#allocation7 + $0x38] sm:$0xff] }
  0x14   :  { %227 = vmatpush.bf16.msra.mxu1 %v473_v3  ;;  %v467_v16 = vld [vmem:[#allocation5] sm:$0xff]  ;;  %309 = vmatpush.bf16.msra.mxu2 %v482_v17  ;;  %v481_v18 = vld [vmem:[#allocation7 + $0x30] sm:$0xff]  ;;  %v480_v19 = vld [vmem:[#allocation7 + $0x28] sm:$0xff] }
  0x15   :  { %v479_v20 = vld [vmem:[#allocation7 + $0x20] sm:$0xff]  ;;  %v478_v21 = vld [vmem:[#allocation7 + $0x18] sm:$0xff]  ;;  %v477_v22 = vld [vmem:[#allocation7 + $0x10] sm:$0xff] }
  0x16   :  { %v489_v23 = vld [vmem:[%s670_s2] ss:$0 sm:$0xff]  ;;  %v476_v29 = vld [vmem:[#allocation7 + $0x8] sm:$0xff] }
  0x17   :  { %145 = vmatpush.bf16.msra.mxu0 %v464_v4  ;;  %v475_v30 = vld [vmem:[#allocation7] sm:$0xff] }
  0x18   :  { %228 = vmatpush.bf16.msra.mxu1 %v472_v5  ;;  %310 = vmatpush.bf16.msra.mxu2 %v481_v18  ;;  %v490_v31 = vld [vmem:[%s672_s4] ss:$0 sm:$0xff]  ;;  %s603_s4 = smov [#allocation8]  }
  0x19   :  { %v491_v37 = vld [vmem:[%s674_s6] ss:$0 sm:$0xff]  ;;  %s350_s6 = sshll.u32 %s603_s4, 4  ;;  %s351_s6 = int_to_ptr.vmem [resolvable:$true] %s350_s6 }
  0x1b   :  { %146 = vmatpush.bf16.msra.mxu0 %v463_v6 }
  0x1c   :  { %229 = vmatpush.bf16.msra.mxu1 %v471_v7  ;;  %311 = vmatpush.bf16.msra.mxu2 %v480_v19 }
  0x1f   :  { %147 = vmatpush.bf16.msra.mxu0 %v462_v8 }
  0x20   :  { %230 = vmatpush.bf16.msra.mxu1 %v470_v9  ;;  %312 = vmatpush.bf16.msra.mxu2 %v479_v20 }
  0x23   :  { %148 = vmatpush.bf16.msra.mxu0 %v461_v10 }
  0x24   :  { %231 = vmatpush.bf16.msra.mxu1 %v469_v11  ;;  %313 = vmatpush.bf16.msra.mxu2 %v478_v21 }
  0x27   :  { %149 = vmatpush.bf16.msra.mxu0 %v460_v12 }
  0x28   :  { %232 = vmatpush.bf16.msra.mxu1 %v468_v15  ;;  %314 = vmatpush.bf16.msra.mxu2 %v477_v22 }
  0x2b   :  { %150 = vmatpush.bf16.msra.mxu0 %v459_v13 }
  0x2c   :  { %233 = vmatpush.bf16.msra.mxu1 %v467_v16  ;;  %315 = vmatpush.bf16.msra.mxu2 %v476_v29 }
  0x2e   :  { %151 = vmatmul.bf16.vlgmr.msra.gmra.mxu0 %v74_v14 }
  0x30   :  { %316 = vmatpush.bf16.msra.mxu2 %v475_v30 }
  0xab   :  { %v152_v24 = vpop.f32.mrf.mxu0 }
  0xac   :  { %v153_v25 = vadd.f32 %v489_v23, %v152_v24 }
  0xae   :  { %v156_v26 = vmax.f32 %v153_v25, 0.0 }
  0xb0   :  { %v157_v27 = vpack.c.bf16 %v156_v26, %v156_v26 }
  0xb2   :  { %234 = vmatmul.bf16.vlgmr.msra.gmra.mxu1 %v157_v27 }
  0xb3   :  { %v154_v28 = vpop.f32.mrf.mxu0 }
 0x12f   :  { %v235_v32 = vpop.f32.mrf.mxu1 }
 0x130   :  { %v236_v33 = vadd.f32 %v490_v31, %v235_v32 }
 0x132   :  { %v239_v34 = vmax.f32 %v236_v33, 0.0 }
 0x134   :  { %v240_v35 = vpack.c.bf16 %v239_v34, %v239_v34 }
 0x136   :  { %317 = vmatmul.bf16.vlgmr.msra.gmra.mxu2 %v240_v35 }
 0x137   :  { %v237_v36 = vpop.f32.mrf.mxu1 }
 0x1b9   :  { %v318_v38 = vpop.f32.mrf.mxu2 }
 0x1ba   :  { %v319_v39 = vadd.f32 %v491_v37, %v318_v38 }
 0x1bc   :  { %322 = vmax.xlane.f32.xlu0 %v319_v39 }
 0x1c1   :  { %v320_v40 = vpop.f32.mrf.mxu2 }
 0x22f   :  { %v323_v41 = vpop.xlane.xlu0 %322 }
 0x230   :  { %v324_v42 = vsub.f32 %v319_v39, %v323_v41 }
 0x232   :  { %v325_v43 = vmul.f32 1.442695, %v324_v42 }
 0x234   :  { %492 = vpow2.f32 %v325_v43 }
 0x23a   :  { %v493_v44 = vpop.eup %492 }
 0x23b   :  { %327 = vadd.xlane.f32.xlu0 %v493_v44 }
 0x2ae   :  { %v328_v45 = vpop.xlane.xlu0 %327 }
 0x2af   :  { %494 = vrcp.f32 %v328_v45  ;;  %v340_v49 = vand.u32 2147483648, %v328_v45  ;;  %v338_v51 = vand.u32 2147483647, %v328_v45  ;;  %vm334_vm1 = vweird.f32 %v328_v45 }
 0x2b1   :  { %v341_v53 = vor.u32 1.1754944e-38, %v340_v49  ;;  %vm339_vm3 = vcmp.eq.f32.partialorder %v338_v51, 8.507059e+37 }
 0x2b5   :  { %v495_v46 = vpop.eup %494 }
 0x2b6   :  { %v330_v47 = vmul.f32 %v495_v46, %v328_v45  ;;  %vm335_vm0 = vweird.f32 %v495_v46 }
 0x2b7   :  { %vm336_vm2 = vmor %vm334_vm1, %vm335_vm0 }
 0x2b8   :  { %v331_v48 = vsub.f32 1.0, %v330_v47 }
 0x2ba   :  { %v332_v50 = vmul.f32 %v495_v46, %v331_v48 }
 0x2bc   :  { %v333_v52 = vadd.f32 %v495_v46, %v332_v50 }
 0x2be   :  { %v337_v54 = vsel %vm336_vm2, %v495_v46, %v333_v52 }
 0x2bf   :  { %v342_v55 = vsel %vm339_vm3, %v341_v53, %v337_v54 }
 0x2c0   :  { %v343_v56 = vmul.f32 %v493_v44, %v342_v55 }
 0x2c2   :  { %344 = vst [vmem:[#allocation8] sm:$0xff] %v343_v56 }
 0x2c3   :  { %355 = dma.vmem_to_hbm [thread:$0]  %s351_s6, 128, %s353_s23, [#allocation4]  }
 0x2c4   :  { %596 = dma.done.wait [#allocation4], 128  }
 0x2c5   :  { %597 = vsyncadd [#allocation4], 4294967168 }
 0x2c6   :  { %360 = vsyncpa [#allocation3], 1 }
 0x2c7   :  { %361 = vsyncpa [#allocation6], 1 }
 0x2c8   :  { %362 = vsyncpa [#allocation4], 1 }

</bundles_post_ra>
